<compile_context>
chip_gen: v7x
topology: tpu7x:2x2x1
jax: 0.10.0
libtpu: 0.0.40
codegen_flags: <defaults>
</compile_context>

<pallas_src>
import functools

import jax
import jax.numpy as jnp
import numpy as np
from jax import lax
from jax.experimental import pallas as pl
from jax.experimental.pallas import tpu as pltpu

_VMEM_LIMIT_BYTES = 32 * 1024 * 1024   # fits default scoped VMEM on v5e/v6e/v7x
_MIN_GRID_STEPS = 4                    # >= 2x TensorCores (v7x) + pipeline overlap
_SUBLANE = {4: 8, 2: 16, 1: 32}        # itemsize -> min second-to-last tile dim


def _sublane_multiple(dtype):
    return _SUBLANE.get(jnp.dtype(dtype).itemsize, 8)


def _pick_default_tile_bytes():
    """~2 MiB blocks hit >=85% of HBM roofline on v5e/v6e; on v7x (3.2 TB/s,
    64 MiB VMEM) ~4 MiB halves the per-step pipeline-overhead share."""
    try:
        if "v7" in jax.devices()[0].device_kind.lower():
            return 4 * 1024 * 1024
    except Exception:
        pass
    try:
        info = pltpu.get_tpu_info()
        if getattr(info, "vmem_capacity_bytes", 128 << 20) <= (64 << 20):
            return 4 * 1024 * 1024
    except Exception:
        pass
    return 2 * 1024 * 1024


_DEFAULT_TILE_BYTES = _pick_default_tile_bytes()


# ----------------------------------------------------------------------------
# Kernels
# ----------------------------------------------------------------------------
def _ring_mask_kernel_hw(h_axis, params_ref, img_ref, out_ref):
    """Block = (tc, TH, W) with W a multiple of 128 (lane-dense stores).

    The ring mask is computed once per (TH, W) tile (amortized over channels)
    with a separable d^2: squares on O(TH)+O(W) vectors, one broadcast add.
    params_ref (SMEM, int32): [xc, yc, r_low^2, r_high^2, invert, apply].
    """
    _, TH, W = img_ref.shape
    xc = params_ref[0]
    yc = params_ref[1]
    rlo2 = params_ref[2]
    rhi2 = params_ref[3]
    invert = params_ref[4]
    apply_flag = params_ref[5]

    row0 = pl.program_id(h_axis) * TH
    rows = row0 + lax.broadcasted_iota(jnp.int32, (TH, 1), 0)
    cols = lax.broadcasted_iota(jnp.int32, (1, W), 1)
    dr = rows - xc
    dc = cols - yc
    d2 = dr * dr + dc * dc                       # (TH, W) via one broadcast add

    # skimage.draw.disk: strictly inside radius**2.
    annulus = jnp.logical_and(d2 < rhi2, d2 >= rlo2)
    # invert == 0: keep complement of the annulus; invert == 1: keep annulus.
    keep = jnp.logical_xor(annulus, invert == 0)
    # p-gate folded in: when the transform does not fire, keep everything.
    keep = jnp.logical_or(keep, apply_flag == 0)

    out_ref[...] = jnp.where(keep[None, :, :], img_ref[...], 0)


def _flat_mask_kernel(mask_ref, img_ref, out_ref):
    """Block = (tc, TN) over the flattened H*W axis; keep mask precomputed in
    XLA (no per-lane integer division inside the kernel)."""
    keep = mask_ref[...] != 0.0
    out_ref[...] = jnp.where(keep, img_ref[...], 0)


# ----------------------------------------------------------------------------
# Tiling / dispatch
# ----------------------------------------------------------------------------
def _apply_ring_mask_hw(img, params, tile_bytes):
    """W % 128 == 0: tile (C, H) with the mask computed inside the kernel."""
    C, H, W = img.shape
    esize = jnp.dtype(img.dtype).itemsize
    sub = _sublane_multiple(img.dtype)
    target = int(tile_bytes)

    slab = C * W * esize * sub                   # minimum-height slab, all channels
    if slab <= target:
        tc = C
        th = max(sub, (target // (C * W * esize)) // sub * sub)
        if th >= H:
            th = H
    else:
        # Large C*W: keep blocks near the target by tiling channels too.
        th = sub
        tc = max(1, min(C, target // (W * esize * sub)))

    # Ensure enough grid steps for DMA/compute overlap and v7x megacore use.
    while pl.cdiv(C, tc) * pl.cdiv(H, th) < _MIN_GRID_STEPS:
        if th > sub:
            new_th = max(sub, (th // 2 // sub) * sub)
            if new_th < th:
                th = new_th
                continue
        if tc > 1:
            tc = max(1, tc // 2)
            continue
        break

    block_bytes = tc * th * W * esize
    if tc == C:
        grid = (pl.cdiv(H, th),)
        kernel = functools.partial(_ring_mask_kernel_hw, 0)
        in_specs = [pl.BlockSpec((C, th, W), lambda h, _p: (0, h, 0))]
        out_spec = pl.BlockSpec((C, th, W), lambda h, _p: (0, h, 0))
        dims = ("parallel",)
    else:
        grid = (pl.cdiv(C, tc), pl.cdiv(H, th))
        kernel = functools.partial(_ring_mask_kernel_hw, 1)
        in_specs = [pl.BlockSpec((tc, th, W), lambda c, h, _p: (c, h, 0))]
        out_spec = pl.BlockSpec((tc, th, W), lambda c, h, _p: (c, h, 0))
        dims = ("parallel", "parallel")

    return pl.pallas_call(
        kernel,
        out_shape=jax.ShapeDtypeStruct((C, H, W), img.dtype),
        grid_spec=pltpu.PrefetchScalarGridSpec(
            num_scalar_prefetch=1,
            grid=grid,
            in_specs=in_specs,
            out_specs=out_spec,
        ),
        compiler_params=pltpu.CompilerParams(
            dimension_semantics=dims,
            vmem_limit_bytes=max(_VMEM_LIMIT_BYTES, 4 * block_bytes + (1 << 20))),
    )(params, img)


def _keep_mask_xla(params, H, W):
    """(H, W) keep mask (1.0 keep / 0.0 zero) computed once in plain XLA."""
    xc, yc = params[0], params[1]
    rlo2, rhi2 = params[2], params[3]
    invert, apply_flag = params[4], params[5]
    rows = lax.broadcasted_iota(jnp.int32, (H, W), 0)
    cols = lax.broadcasted_iota(jnp.int32, (H, W), 1)
    dr = rows - xc
    dc = cols - yc
    d2 = dr * dr + dc * dc
    annulus = jnp.logical_and(d2 < rhi2, d2 >= rlo2)
    keep = jnp.logical_xor(annulus, invert == 0)
    keep = jnp.logical_or(keep, apply_flag == 0)
    return keep.astype(jnp.float32)


def _apply_ring_mask_flat(img, params, tile_bytes):
    """W % 128 != 0: flatten to (C, H*W) so stores are lane-dense; stream the
    precomputed keep mask as a second (small) VMEM input."""
    C, H, W = img.shape
    N = H * W
    esize = jnp.dtype(img.dtype).itemsize
    sub = _sublane_multiple(img.dtype)
    target = int(tile_bytes)

    mask = _keep_mask_xla(params, H, W).reshape(1, N)
    img_flat = img.reshape(C, N)

    # Channel tile: second-to-last dim of the 2-D block -> sublane multiple or
    # the full C extent.
    if C <= sub or C * N * esize <= target:
        tc = C
    else:
        tc = max(sub, min(C, (target // (N * esize)) // sub * sub))

    # Lane tile over the flattened spatial axis (multiple of 128, edge masked).
    if N >= 128:
        tn = max(128, (target // (max(tc, 1) * esize)) // 128 * 128)
        if tn >= N:
            tn = N
    else:
        tn = N

    while pl.cdiv(C, tc) * pl.cdiv(N, tn) < _MIN_GRID_STEPS:
        if tn > 128:
            new_tn = max(128, (tn // 2 // 128) * 128)
            if new_tn < tn:
                tn = new_tn
                continue
        if tc > sub:
            new_tc = max(sub, (tc // 2 // sub) * sub)
            if new_tc < tc:
                tc = new_tc
                continue
        break

    block_bytes = tc * tn * esize
    if tc == C:
        grid = (pl.cdiv(N, tn),)
        in_specs = [pl.BlockSpec((1, tn), lambda n: (0, n)),
                    pl.BlockSpec((C, tn), lambda n: (0, n))]
        out_spec = pl.BlockSpec((C, tn), lambda n: (0, n))
        dims = ("parallel",)
    else:
        grid = (pl.cdiv(C, tc), pl.cdiv(N, tn))
        in_specs = [pl.BlockSpec((1, tn), lambda c, n: (0, n)),
                    pl.BlockSpec((tc, tn), lambda c, n: (c, n))]
        out_spec = pl.BlockSpec((tc, tn), lambda c, n: (c, n))
        dims = ("parallel", "parallel")

    out = pl.pallas_call(
        _flat_mask_kernel,
        out_shape=jax.ShapeDtypeStruct((C, N), img.dtype),
        grid_spec=pltpu.PrefetchScalarGridSpec(
            num_scalar_prefetch=0,
            grid=grid,
            in_specs=in_specs,
            out_specs=out_spec,
        ),
        compiler_params=pltpu.CompilerParams(
            dimension_semantics=dims,
            vmem_limit_bytes=max(_VMEM_LIMIT_BYTES, 4 * block_bytes + (1 << 20))),
    )(mask, img_flat)
    return out.reshape(C, H, W)


# ----------------------------------------------------------------------------
# Random parameters (host-side torch RNG draws reproduced with jax.random)
# ----------------------------------------------------------------------------
def _ring_params(key, H, W, center_delta, radius_high, thickness, p, invert_p):
    ks = jax.random.split(key, 6)

    if p >= 1.0:
        apply_flag = jnp.int32(1)
    elif p <= 0.0:
        apply_flag = jnp.int32(0)
    else:
        apply_flag = (jax.random.uniform(ks[0]) < p).astype(jnp.int32)

    # torch: x, y = H, W after the CHW->HWC transpose; xc = yc = min(x, y)//2.
    xc0 = yc0 = min(H, W) // 2
    cd0, cd1 = center_delta
    dx = (xc0 * (jax.random.uniform(ks[1]) * (cd1 - cd0) + cd0)).astype(jnp.int32)
    dy = (yc0 * (jax.random.uniform(ks[2]) * (cd1 - cd0) + cd0)).astype(jnp.int32)
    xc = jnp.int32(xc0) + dx
    yc = jnp.int32(yc0) + dy

    rh0, rh1 = radius_high
    r_hi = (xc.astype(jnp.float32)
            * (jax.random.uniform(ks[3]) * (rh1 - rh0) + rh0)).astype(jnp.int32)
    t0, t1 = thickness
    r_lo = (r_hi.astype(jnp.float32)
            * (jax.random.uniform(ks[4]) * (t1 - t0) + t0)).astype(jnp.int32)

    if invert_p >= 1.0:
        invert = jnp.int32(1)
    elif invert_p <= 0.0:
        invert = jnp.int32(0)
    else:
        invert = (jax.random.uniform(ks[5]) < invert_p).astype(jnp.int32)

    return jnp.stack([xc, yc, r_lo * r_lo, r_hi * r_hi,
                      invert, apply_flag]).astype(jnp.int32)


@functools.partial(
    jax.jit,
    static_argnames=("center_delta", "radius_high", "thickness", "p",
                     "invert_p", "tile_bytes"))
def random_ring_mask(img, key, center_delta=(0.0, 0.0), radius_high=(0.5, 1.5),
                     thickness=(0.25, 0.75), p=1.0, invert_p=0.0,
                     tile_bytes=_DEFAULT_TILE_BYTES):
    C, H, W = img.shape
    if max(H, W) > 16384:
        raise ValueError("H/W too large: d^2 is computed in int32.")
    params = _ring_params(key, H, W, center_delta, radius_high, thickness,
                          p, invert_p)
    if p <= 0.0:
        # Static skip: the transform never fires; no kernel launch at all.
        return img, params
    # For 0 < p < 1 the runtime `apply` flag is folded into the mask inside
    # the kernel (one read+write either way; no lax.cond copy branch).
    if W % 128 == 0:
        out = _apply_ring_mask_hw(img, params, tile_bytes)
    else:
        out = _apply_ring_mask_flat(img, params, tile_bytes)
    return out, params


# ----------------------------------------------------------------------------
# Reference + tests
# ----------------------------------------------------------------------------
def _numpy_ref(img_np, params):
    """Pure-numpy reference with draw_ring semantics, using the same scalars."""
    xc, yc, rlo2, rhi2, invert, applied = [int(v) for v in np.asarray(params)]
    if not applied:
        return img_np
    _, H, W = img_np.shape
    rows, cols = np.meshgrid(np.arange(H), np.arange(W), indexing="ij")
    d2 = (rows - xc) ** 2 + (cols - yc) ** 2
    annulus = (d2 < rhi2) & (d2 >= rlo2)
    if invert:
        return np.where(annulus[None], img_np, 0.0).astype(img_np.dtype)
    return np.where(annulus[None], 0.0, img_np).astype(img_np.dtype)


if __name__ == "__main__":
    keys = jax.random.split(jax.random.PRNGKey(0), 10)

    def check(out, img, params):
        out_np = np.asarray(out.astype(jnp.float32))
        img_np = np.asarray(img.astype(jnp.float32))
        np.testing.assert_allclose(out_np, _numpy_ref(img_np, params),
                                   rtol=0, atol=0)

    # Test 1: W not lane-dense -> flattened (C, H*W) path with precomputed mask.
    img1 = jax.random.normal(keys[0], (4, 16, 16), dtype=jnp.float32)
    out1, p1 = random_ring_mask(img1, keys[1])
    out1 = jax.block_until_ready(out1)
    check(out1, img1, p1)

    # Test 2: lane-dense W, inverted ring; small tile forces a multi-step grid
    # over H (exercises row offsets + min-grid-steps shrinking).
    img2 = jax.random.normal(keys[2], (3, 48, 128), dtype=jnp.float32)
    out2, p2 = random_ring_mask(img2, keys[3], radius_high=(0.8, 1.2),
                                invert_p=1.0, tile_bytes=32 * 1024)
    out2 = jax.block_until_ready(out2)
    check(out2, img2, p2)

    # Test 3: static p = 0 -> identity, no kernel launch.
    out3, p3 = random_ring_mask(img1, keys[4], p=0.0)
    out3 = jax.block_until_ready(out3)
    np.testing.assert_allclose(np.asarray(out3), np.asarray(img1), rtol=0, atol=0)

    # Test 4: bf16 image -> dtype-aware sublane rounding (H tile multiple of 16).
    img4 = jax.random.normal(keys[5], (3, 64, 128),
                             dtype=jnp.float32).astype(jnp.bfloat16)
    out4, p4 = random_ring_mask(img4, keys[6], tile_bytes=32 * 1024)
    out4 = jax.block_until_ready(out4)
    check(out4, img4, p4)

    # Test 5: large channel count -> channel-tiled 2-D grid (blow-up guard).
    img5 = jax.random.normal(keys[7], (64, 16, 128), dtype=jnp.float32)
    out5, p5 = random_ring_mask(img5, keys[8], tile_bytes=16 * 1024)
    out5 = jax.block_until_ready(out5)
    check(out5, img5, p5)

    print("KERNEL_OK")
</pallas_src>

<mosaic_0001>
module attributes {stable_mosaic.version = 11 : i64} {
  func.func @_flat_mask_kernel(%arg0: i32, %arg1: memref<1x128xf32, #tpu.memory_space<vmem>>, %arg2: memref<4x128xf32, #tpu.memory_space<vmem>>, %arg3: memref<4x128xf32, #tpu.memory_space<vmem>>) attributes {dimension_semantics = [#tpu.dimension_semantics<parallel>], iteration_bounds = array<i64: 2>, scalar_prefetch = 0 : i64, scratch_operands = 0 : i64, tpu.core_type = #tpu.core_type<tc>, window_params = [{transform_indices = @transform_0, window_bounds = array<i64: 1, 128>}, {transform_indices = @transform_1, window_bounds = array<i64: 4, 128>}, {transform_indices = @transform_2, window_bounds = array<i64: 4, 128>}]} {
    %c0 = arith.constant 0 : index
    %c0_0 = arith.constant 0 : index
    %0 = vector.load %arg1[%c0, %c0_0] : memref<1x128xf32, #tpu.memory_space<vmem>>, vector<1x128xf32>
    %cst = arith.constant 0.000000e+00 : f32
    %1 = vector.broadcast %cst : f32 to vector<1x128xf32>
    %2 = arith.cmpf one, %0, %1 : vector<1x128xf32>
    %c0_1 = arith.constant 0 : index
    %c0_2 = arith.constant 0 : index
    %3 = vector.load %arg2[%c0_1, %c0_2] : memref<4x128xf32, #tpu.memory_space<vmem>>, vector<4x128xf32>
    %c0_i32 = arith.constant 0 : i32
    %4 = arith.sitofp %c0_i32 : i32 to f32
    %5 = vector.shape_cast %2 : vector<1x128xi1> to vector<1x128xi1>
    %6 = vector.broadcast %5 : vector<1x128xi1> to vector<4x128xi1>
    %7 = vector.broadcast %4 : f32 to vector<4x128xf32>
    %8 = arith.select %6, %3, %7 : vector<4x128xi1>, vector<4x128xf32>
    %c0_3 = arith.constant 0 : index
    %c0_4 = arith.constant 0 : index
    %9 = vector.load %arg3[%c0_3, %c0_4] : memref<4x128xf32, #tpu.memory_space<vmem>>, vector<4x128xf32>
    tpu.vector_store %arg3[%c0_3, %c0_4], %8 {strides = array<i32>} : memref<4x128xf32, #tpu.memory_space<vmem>>, vector<4x128xf32>,
    return
  }
  func.func @transform_0(%arg0: i32) -> (i32, i32) {
    %c0_i32 = arith.constant 0 : i32
    %c0_i32_0 = arith.constant 0 : i32
    return %c0_i32, %arg0 : i32, i32
  }
  func.func @transform_1(%arg0: i32) -> (i32, i32) {
    %c0_i32 = arith.constant 0 : i32
    %c0_i32_0 = arith.constant 0 : i32
    return %c0_i32, %arg0 : i32, i32
  }
  func.func @transform_2(%arg0: i32) -> (i32, i32) {
    %c0_i32 = arith.constant 0 : i32
    %c0_i32_0 = arith.constant 0 : i32
    return %c0_i32, %arg0 : i32, i32
  }
}

</mosaic_0001>

<bundles_post_ra>
// kernel: random_ring_mask.1
= control target key start
LH: loop header
LB: loop body
LE: loop exit
PB: predicated region body
PF: predicated region fallthrough
CT: control target
= control target key end

     0   :  { %s268_s9 = smov 0   ;;  %s282_s0 = inlined_call_operand.vmem [shape: f32[1,256], index: 0, kind: input, shape index: {}]   ;;  %s283_s1 = inlined_call_operand.vmem [shape: f32[4,256], index: 1, kind: input, shape index: {}]   ;;  %s284_s2 = inlined_call_operand.vmem [shape: f32[4,256], index: 2, kind: output, shape index: {}]  }
   0x1 LB: > { %s226_s10 = sadd.s32 4294967295, %s250_s9   ;;  %p230_p0 = scmp.ge.s32.totalorder %s250_s9, 1  ;;  %s250_s9 = sphi %s268_s9, %s12_s9  }
   0x2   : > { %p119_p1 = scmp.lt.s32.totalorder %s250_s9, 3 }
   0x4   : > { %p120_p2 = pnand %p230_p0, %p119_p1 }
   0x5   : > { %p142_p3 = scmp.lt.s32.totalorder (!%p120_p2), %s226_s10, 1  ;;  %v157_v0 = vlaneseq (!%p120_p2)  ;;  %v252_v4 = vmov (!%p120_p2), 0  }
   0x6   : > { %123 = sbr.rel (%p120_p2) target bundleno = 23 (0x17), region = 28 }
   0x7   : > { %v158_v1 = vshrl.u32 (!%p120_p2), %v157_v0, 7 }
   0x9   : > { %v159_v2 = vsub.s32 (!%p120_p2), 0, %v158_v1 }
   0xd   : > { %s286_s10 = smov (!%p142_p3, %s226_s10), 1 }
   0xe   : > { %s144_s13 = scalar_lea.vmem %s282_s0, %s286_s10  ;;  %s231_s14 = sshll.u32 %s286_s10, 2 }
   0xf   : > { %s148_s17 = scalar_lea.vmem %s283_s1, %s231_s14  ;;  %v153_v3 = vld [vmem:[%s144_s13] sm:$0x1]  ;;  %s152_s20 = scalar_lea.vmem %s284_s2, %s231_s14 }
  0x10   : > { %vm154_vm0 = vcmp.ne.f32.partialorder %v153_v3, 0.0  ;;  %v155_v6 = vld [vmem:[%s148_s17] sm:$0xf] }
  0x11   : > { %v156_v5 = vsel %vm154_vm0, 1, %v252_v4 }
  0x12   : > { %v160_v7 = vrot.slane %v156_v5, %v159_v2 }
  0x14   : > { %vm161_vm1 = vcmp.eq.s32.totalorder %v160_v7, 1 }
  0x15   : > { %v162_v8 = vsel %vm161_vm1, %v155_v6, 0.0 }
  0x16   : > { %163 = vst [vmem:[%s152_s20] sm:$0xf] %v162_v8 }
  0x17 PF: > { %s12_s9 = sadd.s32 1, %s250_s9  }
  0x18   : > { %p9_p4 = scmp.ge.s32.totalorder %s12_s9, 4  }
  0x1a   :  { %11 = sbr.rel (!%p9_p4) target bundleno = 1 (0x1), region = 61 }

</bundles_post_ra>
